<compile_context>
chip_gen: v5e
topology: v5e:2x2
jax: 0.10.0
libtpu: 0.0.40
codegen_flags: <defaults>
</compile_context>

<pallas_src>
import functools
import math

import jax
import jax.numpy as jnp
from jax.experimental import pallas as pl
from jax.experimental.pallas import tpu as pltpu


def _round_up(x, m):
    return ((x + m - 1) // m) * m


def _mlp_kernel(x_ref, *refs, n_layers):
    """Fused MLP: refs = (w0, b0, w1, b1, ..., w_{L-1}, b_{L-1}, alpha_ref, o_ref)."""
    o_ref = refs[-1]
    alpha_ref = refs[-2]          # (1,) f32 scalar in SMEM
    wb = refs[:-2]
    a = alpha_ref[0]

    h = x_ref[...].astype(jnp.float32)           # (tm, K) f32
    for layer_id in range(n_layers):
        w_ref = wb[2 * layer_id]                 # (K_l, N_l) bf16, VMEM-resident
        b_ref = wb[2 * layer_id + 1]             # (1, N_l) f32
        # bf16 MXU matmul with f32 accumulation.
        y = jnp.dot(h.astype(jnp.bfloat16), w_ref[...],
                    preferred_element_type=jnp.float32)
        y = y + b_ref[...]                       # bias broadcast over rows (f32)
        if layer_id < n_layers - 1:
            # PReLU with single shared alpha; dropout is identity (eval mode).
            y = jnp.where(y >= 0.0, y, a * y)
        h = y
    o_ref[...] = h.astype(o_ref.dtype)


def prepare_feedforward_params(params, alpha):
    """One-time padding + bf16 conversion. Do NOT call per forward pass.

    params: list of (w_t [K, N], b [1, N]) float32 (PyTorch weights pre-transposed).
    Returns (padded_params, alpha_arr, out_feats) ready for feedforward_net.
    """
    in_feats = params[0][0].shape[0]
    out_feats = params[-1][0].shape[1]

    padded = []
    cur_in = in_feats                 # x's feature dim stays unpadded (full-dim block is legal)
    for (w_t, b) in params:
        k, n = w_t.shape
        n_pad = _round_up(n, 128)
        wp = (jnp.zeros((cur_in, n_pad), dtype=jnp.float32)
              .at[:k, :n].set(jnp.asarray(w_t, jnp.float32))
              .astype(jnp.bfloat16))
        bp = (jnp.zeros((1, n_pad), dtype=jnp.float32)
              .at[:, :n].set(jnp.asarray(b, jnp.float32).reshape(1, n)))
        padded.append((wp, bp))
        cur_in = n_pad

    alpha_arr = jnp.asarray(alpha, dtype=jnp.float32).reshape((1,))
    return padded, alpha_arr, out_feats


def feedforward_net(x, prepared, *, tm=256):
    """Forward pass of FeedForwardNet as one fused Pallas kernel.

    x:        [M, in_feats] float32
    prepared: output of prepare_feedforward_params (padded bf16 weights, f32 biases, alpha)
    """
    padded_params, alpha_arr, out_feats = prepared
    n_layers = len(padded_params)
    M, K = x.shape
    assert K == padded_params[0][0].shape[0], "x feature dim mismatch with prepared params"
    N_out_pad = padded_params[-1][0].shape[1]

    # Row tile: large enough to fill the MXU, but keep >= 2 grid steps when M allows so
    # the "parallel" axis can shard across v7x's two TensorCores.
    if M >= 2 * tm:
        row_tile = tm
    else:
        row_tile = min(max(_round_up(pl.cdiv(M, 2), 8), 8), _round_up(M, 8))
    M_pad = _round_up(M, row_tile)
    x_pad = x if M_pad == M else jnp.zeros((M_pad, K), x.dtype).at[:M, :].set(x)
    grid = (M_pad // row_tile,)

    max_npad = max(wp.shape[1] for (wp, _) in padded_params)
    kernel = functools.partial(_mlp_kernel, n_layers=n_layers)

    def build_and_run(single_buffer_weights):
        weight_pm = pl.Buffered(1) if single_buffer_weights else None

        in_specs = [pl.BlockSpec((row_tile, K), lambda i: (i, 0))]   # x row-tile
        flat_inputs = [x_pad]
        for (wp, bp) in padded_params:
            kp, npad = wp.shape
            if weight_pm is not None:
                in_specs.append(pl.BlockSpec((kp, npad), lambda i: (0, 0),
                                             pipeline_mode=weight_pm))
                in_specs.append(pl.BlockSpec((1, npad), lambda i: (0, 0),
                                             pipeline_mode=weight_pm))
            else:
                in_specs.append(pl.BlockSpec((kp, npad), lambda i: (0, 0)))
                in_specs.append(pl.BlockSpec((1, npad), lambda i: (0, 0)))
            flat_inputs.append(wp)
            flat_inputs.append(bp)
        # PReLU alpha as an SMEM scalar (no padded VMEM tile / DMA descriptor).
        in_specs.append(pl.BlockSpec(memory_space=pltpu.MemorySpace.SMEM))
        flat_inputs.append(alpha_arr)

        out_spec = pl.BlockSpec((row_tile, N_out_pad), lambda i: (i, 0))

        # ---- VMEM budget: resident weights (xbufcount) + pipelined x/out + h headroom ----
        bufcount = 1 if single_buffer_weights else 2
        resident = sum(wp.size * wp.dtype.itemsize + bp.size * bp.dtype.itemsize
                       for (wp, bp) in padded_params) * bufcount
        io_bytes = 2 * row_tile * K * 4 + 2 * row_tile * N_out_pad * 4
        scratch = 4 * row_tile * max_npad * 4
        vmem_limit = int(min(max(resident + io_bytes + scratch + (4 << 20), 16 << 20),
                             112 << 20))

        # ---- cost estimate -----------------------------------------------------------
        flops = 0
        bytes_accessed = x_pad.size * x_pad.dtype.itemsize + M_pad * N_out_pad * 4
        for (wp, bp) in padded_params:
            kp, npad = wp.shape
            flops += 2 * M_pad * kp * npad
            bytes_accessed += wp.size * wp.dtype.itemsize + bp.size * bp.dtype.itemsize

        y = pl.pallas_call(
            kernel,
            out_shape=jax.ShapeDtypeStruct((M_pad, N_out_pad), jnp.float32),
            grid_spec=pltpu.PrefetchScalarGridSpec(
                num_scalar_prefetch=0,
                grid=grid,
                in_specs=in_specs,
                out_specs=out_spec,
            ),
            compiler_params=pltpu.CompilerParams(
                dimension_semantics=("parallel",),
                vmem_limit_bytes=vmem_limit,
            ),
            cost_estimate=pl.CostEstimate(
                flops=flops, transcendentals=0, bytes_accessed=bytes_accessed),
        )(*flat_inputs)
        return jax.block_until_ready(y)

    try:
        y_pad = build_and_run(True)     # single-buffered resident weights (preferred)
    except Exception:
        y_pad = build_and_run(False)    # fallback: default double-buffering

    if M_pad == M and N_out_pad == out_feats:
        return y_pad                    # no post-kernel slice/copy needed
    return y_pad[:M, :out_feats]


def init_feedforward_params(key, in_feats, hidden, out_feats, n_layers):
    """Mirror FeedForwardNet.reset_parameters(): Xavier-uniform (gain=sqrt(2)), zero bias."""
    gain = math.sqrt(2.0)
    if n_layers == 1:
        dims = [(in_feats, out_feats)]
    else:
        dims = [(in_feats, hidden)]
        dims += [(hidden, hidden)] * (n_layers - 2)
        dims += [(hidden, out_feats)]

    params = []
    for (fan_in, fan_out) in dims:
        key, sub = jax.random.split(key)
        bound = gain * math.sqrt(6.0 / (fan_in + fan_out))
        # PyTorch weight is [out, in]; we store its transpose [in, out].
        w_t = jax.random.uniform(sub, (fan_in, fan_out), dtype=jnp.float32,
                                 minval=-bound, maxval=bound)
        b = jnp.zeros((1, fan_out), dtype=jnp.float32)
        params.append((w_t, b))

    alpha = jnp.full((1,), 0.25, dtype=jnp.float32)  # nn.PReLU() default, shared
    return params, alpha


def _reference_forward(x, params, alpha, n_layers, *, bf16_matmul=False):
    """Pure-JAX reference (eval-mode) for correctness checking."""
    a = jnp.asarray(alpha, jnp.float32).reshape(())
    h = x
    for layer_id, (w_t, b) in enumerate(params):
        if bf16_matmul:
            h = jnp.dot(h.astype(jnp.bfloat16), w_t.astype(jnp.bfloat16),
                        preferred_element_type=jnp.float32) + b
        else:
            h = h @ w_t + b
        if layer_id < n_layers - 1:
            h = jnp.where(h >= 0.0, h, a * h)
    return h


if __name__ == "__main__":
    key = jax.random.PRNGKey(0)

    # Small shapes consistent with the module's forward: x is [batch, in_feats].
    batch = 16
    in_feats = 32
    hidden = 32
    out_feats = 16
    n_layers = 3
    dropout = 0.5  # eval mode -> identity

    key, xkey = jax.random.split(key)
    x = jax.random.normal(xkey, (batch, in_feats), dtype=jnp.float32)

    params, alpha = init_feedforward_params(
        key, in_feats, hidden, out_feats, n_layers)

    # One-time parameter preparation (padding + bf16 conversion) outside the call path.
    prepared = prepare_feedforward_params(params, alpha)

    y = feedforward_net(x, prepared)
    jax.block_until_ready(y)

    y_ref_f32 = _reference_forward(x, params, alpha, n_layers)
    y_ref_bf16 = _reference_forward(x, params, alpha, n_layers, bf16_matmul=True)

    assert y.shape == (batch, out_feats)
    assert y.dtype == jnp.float32
    # Tight check vs. a bf16-matmul / f32-accumulate emulation of the kernel.
    assert bool(jnp.allclose(y, y_ref_bf16, atol=1e-3, rtol=1e-3)), \
        "mismatch vs bf16-emulated reference"
    # Loose check vs. the pure-f32 reference (bf16 weight rounding ~1e-2 relative).
    assert bool(jnp.allclose(y, y_ref_f32, atol=5e-2, rtol=5e-2)), \
        "mismatch vs f32 reference"
    print("KERNEL_OK")
</pallas_src>

<mosaic_0001>
module attributes {stable_mosaic.version = 11 : i64} {
  func.func @_mlp_kernel(%arg0: i32, %arg1: memref<8x32xf32, #tpu.memory_space<vmem>>, %arg2: memref<32x128xbf16, #tpu.memory_space<vmem>>, %arg3: memref<1x128xf32, #tpu.memory_space<vmem>>, %arg4: memref<128x128xbf16, #tpu.memory_space<vmem>>, %arg5: memref<1x128xf32, #tpu.memory_space<vmem>>, %arg6: memref<128x128xbf16, #tpu.memory_space<vmem>>, %arg7: memref<1x128xf32, #tpu.memory_space<vmem>>, %arg8: memref<1xf32, #tpu.memory_space<smem>>, %arg9: memref<8x128xf32, #tpu.memory_space<vmem>>) attributes {dimension_semantics = [#tpu.dimension_semantics<parallel>], iteration_bounds = array<i64: 2>, scalar_prefetch = 0 : i64, scratch_operands = 0 : i64, tpu.core_type = #tpu.core_type<tc>, window_params = [{transform_indices = @transform_0, window_bounds = array<i64: 8, 32>}, {pipeline_mode = #tpu.pipeline_mode<synchronous>, transform_indices = @transform_1, window_bounds = array<i64: 32, 128>}, {pipeline_mode = #tpu.pipeline_mode<synchronous>, transform_indices = @transform_2, window_bounds = array<i64: 1, 128>}, {pipeline_mode = #tpu.pipeline_mode<synchronous>, transform_indices = @transform_3, window_bounds = array<i64: 128, 128>}, {pipeline_mode = #tpu.pipeline_mode<synchronous>, transform_indices = @transform_4, window_bounds = array<i64: 1, 128>}, {pipeline_mode = #tpu.pipeline_mode<synchronous>, transform_indices = @transform_5, window_bounds = array<i64: 128, 128>}, {pipeline_mode = #tpu.pipeline_mode<synchronous>, transform_indices = @transform_6, window_bounds = array<i64: 1, 128>}, {transform_indices = @transform_7, window_bounds = array<i64: 1>}, {transform_indices = @transform_8, window_bounds = array<i64: 8, 128>}]} {
    %c0 = arith.constant 0 : index
    %0 = memref.load %arg8[%c0] : memref<1xf32, #tpu.memory_space<smem>>
    %c0_0 = arith.constant 0 : index
    %c0_1 = arith.constant 0 : index
    %1 = vector.load %arg1[%c0_0, %c0_1] : memref<8x32xf32, #tpu.memory_space<vmem>>, vector<8x32xf32>
    %2 = arith.truncf %1 : vector<8x32xf32> to vector<8x32xbf16>
    %c0_2 = arith.constant 0 : index
    %c0_3 = arith.constant 0 : index
    %3 = vector.load %arg2[%c0_2, %c0_3] : memref<32x128xbf16, #tpu.memory_space<vmem>>, vector<32x128xbf16>
    %cst = arith.constant dense<0.000000e+00> : vector<8x128xf32>
    %4 = tpu.matmul %2, %3, %cst {dimension_numbers = #tpu.dot_dimension_numbers<[1], [0], [0], [1], [0, 0, 1, 1], [], []>} : vector<8x32xbf16>, vector<32x128xbf16>, vector<8x128xf32> -> vector<8x128xf32>
    %c0_4 = arith.constant 0 : index
    %c0_5 = arith.constant 0 : index
    %5 = vector.load %arg3[%c0_4, %c0_5] : memref<1x128xf32, #tpu.memory_space<vmem>>, vector<1x128xf32>
    %6 = vector.broadcast %5 : vector<1x128xf32> to vector<8x128xf32>
    %7 = arith.addf %4, %6 : vector<8x128xf32>
    %cst_6 = arith.constant 0.000000e+00 : f32
    %8 = vector.broadcast %cst_6 : f32 to vector<8x128xf32>
    %9 = arith.cmpf oge, %7, %8 : vector<8x128xf32>
    %10 = vector.broadcast %0 : f32 to vector<8x128xf32>
    %11 = arith.mulf %10, %7 : vector<8x128xf32>
    %12 = arith.select %9, %7, %11 : vector<8x128xi1>, vector<8x128xf32>
    %13 = arith.truncf %12 : vector<8x128xf32> to vector<8x128xbf16>
    %c0_7 = arith.constant 0 : index
    %c0_8 = arith.constant 0 : index
    %14 = vector.load %arg4[%c0_7, %c0_8] : memref<128x128xbf16, #tpu.memory_space<vmem>>, vector<128x128xbf16>
    %cst_9 = arith.constant dense<0.000000e+00> : vector<8x128xf32>
    %15 = tpu.matmul %13, %14, %cst_9 {dimension_numbers = #tpu.dot_dimension_numbers<[1], [0], [0], [1], [0, 0, 1, 1], [], []>} : vector<8x128xbf16>, vector<128x128xbf16>, vector<8x128xf32> -> vector<8x128xf32>
    %c0_10 = arith.constant 0 : index
    %c0_11 = arith.constant 0 : index
    %16 = vector.load %arg5[%c0_10, %c0_11] : memref<1x128xf32, #tpu.memory_space<vmem>>, vector<1x128xf32>
    %17 = vector.broadcast %16 : vector<1x128xf32> to vector<8x128xf32>
    %18 = arith.addf %15, %17 : vector<8x128xf32>
    %cst_12 = arith.constant 0.000000e+00 : f32
    %19 = vector.broadcast %cst_12 : f32 to vector<8x128xf32>
    %20 = arith.cmpf oge, %18, %19 : vector<8x128xf32>
    %21 = vector.broadcast %0 : f32 to vector<8x128xf32>
    %22 = arith.mulf %21, %18 : vector<8x128xf32>
    %23 = arith.select %20, %18, %22 : vector<8x128xi1>, vector<8x128xf32>
    %24 = arith.truncf %23 : vector<8x128xf32> to vector<8x128xbf16>
    %c0_13 = arith.constant 0 : index
    %c0_14 = arith.constant 0 : index
    %25 = vector.load %arg6[%c0_13, %c0_14] : memref<128x128xbf16, #tpu.memory_space<vmem>>, vector<128x128xbf16>
    %cst_15 = arith.constant dense<0.000000e+00> : vector<8x128xf32>
    %26 = tpu.matmul %24, %25, %cst_15 {dimension_numbers = #tpu.dot_dimension_numbers<[1], [0], [0], [1], [0, 0, 1, 1], [], []>} : vector<8x128xbf16>, vector<128x128xbf16>, vector<8x128xf32> -> vector<8x128xf32>
    %c0_16 = arith.constant 0 : index
    %c0_17 = arith.constant 0 : index
    %27 = vector.load %arg7[%c0_16, %c0_17] : memref<1x128xf32, #tpu.memory_space<vmem>>, vector<1x128xf32>
    %28 = vector.broadcast %27 : vector<1x128xf32> to vector<8x128xf32>
    %29 = arith.addf %26, %28 : vector<8x128xf32>
    %c0_18 = arith.constant 0 : index
    %c0_19 = arith.constant 0 : index
    %30 = vector.load %arg9[%c0_18, %c0_19] : memref<8x128xf32, #tpu.memory_space<vmem>>, vector<8x128xf32>
    tpu.vector_store %arg9[%c0_18, %c0_19], %29 {strides = array<i32>} : memref<8x128xf32, #tpu.memory_space<vmem>>, vector<8x128xf32>,
    return
  }
  func.func @transform_0(%arg0: i32) -> (i32, i32) {
    %c0_i32 = arith.constant 0 : i32
    %c0_i32_0 = arith.constant 0 : i32
    return %arg0, %c0_i32 : i32, i32
  }
  func.func @transform_1(%arg0: i32) -> (i32, i32) {
    %c0_i32 = arith.constant 0 : i32
    %c0_i32_0 = arith.constant 0 : i32
    %c0_i32_1 = arith.constant 0 : i32
    return %c0_i32, %c0_i32_0 : i32, i32
  }
  func.func @transform_2(%arg0: i32) -> (i32, i32) {
    %c0_i32 = arith.constant 0 : i32
    %c0_i32_0 = arith.constant 0 : i32
    %c0_i32_1 = arith.constant 0 : i32
    return %c0_i32, %c0_i32_0 : i32, i32
  }
  func.func @transform_3(%arg0: i32) -> (i32, i32) {
    %c0_i32 = arith.constant 0 : i32
    %c0_i32_0 = arith.constant 0 : i32
    %c0_i32_1 = arith.constant 0 : i32
    return %c0_i32, %c0_i32_0 : i32, i32
  }
  func.func @transform_4(%arg0: i32) -> (i32, i32) {
    %c0_i32 = arith.constant 0 : i32
    %c0_i32_0 = arith.constant 0 : i32
    %c0_i32_1 = arith.constant 0 : i32
    return %c0_i32, %c0_i32_0 : i32, i32
  }
  func.func @transform_5(%arg0: i32) -> (i32, i32) {
    %c0_i32 = arith.constant 0 : i32
    %c0_i32_0 = arith.constant 0 : i32
    %c0_i32_1 = arith.constant 0 : i32
    return %c0_i32, %c0_i32_0 : i32, i32
  }
  func.func @transform_6(%arg0: i32) -> (i32, i32) {
    %c0_i32 = arith.constant 0 : i32
    %c0_i32_0 = arith.constant 0 : i32
    %c0_i32_1 = arith.constant 0 : i32
    return %c0_i32, %c0_i32_0 : i32, i32
  }
  func.func @transform_7(%arg0: i32) -> i32 {
    %c0_i32 = arith.constant 0 : i32
    %c0_i32_0 = arith.constant 0 : i32
    return %c0_i32 : i32
  }
  func.func @transform_8(%arg0: i32) -> (i32, i32) {
    %c0_i32 = arith.constant 0 : i32
    %c0_i32_0 = arith.constant 0 : i32
    return %arg0, %c0_i32 : i32, i32
  }
}

module attributes {stable_mosaic.version = 11 : i64} {
  func.func @_mlp_kernel(%arg0: i32, %arg1: memref<8x32xf32, #tpu.memory_space<vmem>>, %arg2: memref<32x128xbf16, #tpu.memory_space<vmem>>, %arg3: memref<1x128xf32, #tpu.memory_space<vmem>>, %arg4: memref<128x128xbf16, #tpu.memory_space<vmem>>, %arg5: memref<1x128xf32, #tpu.memory_space<vmem>>, %arg6: memref<128x128xbf16, #tpu.memory_space<vmem>>, %arg7: memref<1x128xf32, #tpu.memory_space<vmem>>, %arg8: memref<1xf32, #tpu.memory_space<smem>>, %arg9: memref<8x128xf32, #tpu.memory_space<vmem>>) attributes {dimension_semantics = [#tpu.dimension_semantics<parallel>], iteration_bounds = array<i64: 2>, scalar_prefetch = 0 : i64, scratch_operands = 0 : i64, tpu.core_type = #tpu.core_type<tc>, window_params = [{transform_indices = @transform_0, window_bounds = array<i64: 8, 32>}, {pipeline_mode = #tpu.pipeline_mode<synchronous>, transform_indices = @transform_1, window_bounds = array<i64: 32, 128>}, {pipeline_mode = #tpu.pipeline_mode<synchronous>, transform_indices = @transform_2, window_bounds = array<i64: 1, 128>}, {pipeline_mode = #tpu.pipeline_mode<synchronous>, transform_indices = @transform_3, window_bounds = array<i64: 128, 128>}, {pipeline_mode = #tpu.pipeline_mode<synchronous>, transform_indices = @transform_4, window_bounds = array<i64: 1, 128>}, {pipeline_mode = #tpu.pipeline_mode<synchronous>, transform_indices = @transform_5, window_bounds = array<i64: 128, 128>}, {pipeline_mode = #tpu.pipeline_mode<synchronous>, transform_indices = @transform_6, window_bounds = array<i64: 1, 128>}, {transform_indices = @transform_7, window_bounds = array<i64: 1>}, {transform_indices = @transform_8, window_bounds = array<i64: 8, 128>}]} {
    %c0 = arith.constant 0 : index
    %0 = memref.load %arg8[%c0] : memref<1xf32, #tpu.memory_space<smem>>
    %c0_0 = arith.constant 0 : index
    %c0_1 = arith.constant 0 : index
    %1 = vector.load %arg1[%c0_0, %c0_1] : memref<8x32xf32, #tpu.memory_space<vmem>>, vector<8x32xf32>
    %2 = arith.truncf %1 : vector<8x32xf32> to vector<8x32xbf16>
    %c0_2 = arith.constant 0 : index
    %c0_3 = arith.constant 0 : index
    %3 = vector.load %arg2[%c0_2, %c0_3] : memref<32x128xbf16, #tpu.memory_space<vmem>>, vector<32x128xbf16>
    %cst = arith.constant dense<0.000000e+00> : vector<8x128xf32>
    %4 = tpu.matmul %2, %3, %cst {dimension_numbers = #tpu.dot_dimension_numbers<[1], [0], [0], [1], [0, 0, 1, 1], [], []>} : vector<8x32xbf16>, vector<32x128xbf16>, vector<8x128xf32> -> vector<8x128xf32>
    %c0_4 = arith.constant 0 : index
    %c0_5 = arith.constant 0 : index
    %5 = vector.load %arg3[%c0_4, %c0_5] : memref<1x128xf32, #tpu.memory_space<vmem>>, vector<1x128xf32>
    %6 = vector.broadcast %5 : vector<1x128xf32> to vector<8x128xf32>
    %7 = arith.addf %4, %6 : vector<8x128xf32>
    %cst_6 = arith.constant 0.000000e+00 : f32
    %8 = vector.broadcast %cst_6 : f32 to vector<8x128xf32>
    %9 = arith.cmpf oge, %7, %8 : vector<8x128xf32>
    %10 = vector.broadcast %0 : f32 to vector<8x128xf32>
    %11 = arith.mulf %10, %7 : vector<8x128xf32>
    %12 = arith.select %9, %7, %11 : vector<8x128xi1>, vector<8x128xf32>
    %13 = arith.truncf %12 : vector<8x128xf32> to vector<8x128xbf16>
    %c0_7 = arith.constant 0 : index
    %c0_8 = arith.constant 0 : index
    %14 = vector.load %arg4[%c0_7, %c0_8] : memref<128x128xbf16, #tpu.memory_space<vmem>>, vector<128x128xbf16>
    %cst_9 = arith.constant dense<0.000000e+00> : vector<8x128xf32>
    %15 = tpu.matmul %13, %14, %cst_9 {dimension_numbers = #tpu.dot_dimension_numbers<[1], [0], [0], [1], [0, 0, 1, 1], [], []>} : vector<8x128xbf16>, vector<128x128xbf16>, vector<8x128xf32> -> vector<8x128xf32>
    %c0_10 = arith.constant 0 : index
    %c0_11 = arith.constant 0 : index
    %16 = vector.load %arg5[%c0_10, %c0_11] : memref<1x128xf32, #tpu.memory_space<vmem>>, vector<1x128xf32>
    %17 = vector.broadcast %16 : vector<1x128xf32> to vector<8x128xf32>
    %18 = arith.addf %15, %17 : vector<8x128xf32>
    %cst_12 = arith.constant 0.000000e+00 : f32
    %19 = vector.broadcast %cst_12 : f32 to vector<8x128xf32>
    %20 = arith.cmpf oge, %18, %19 : vector<8x128xf32>
    %21 = vector.broadcast %0 : f32 to vector<8x128xf32>
    %22 = arith.mulf %21, %18 : vector<8x128xf32>
    %23 = arith.select %20, %18, %22 : vector<8x128xi1>, vector<8x128xf32>
    %24 = arith.truncf %23 : vector<8x128xf32> to vector<8x128xbf16>
    %c0_13 = arith.constant 0 : index
    %c0_14 = arith.constant 0 : index
    %25 = vector.load %arg6[%c0_13, %c0_14] : memref<128x128xbf16, #tpu.memory_space<vmem>>, vector<128x128xbf16>
    %cst_15 = arith.constant dense<0.000000e+00> : vector<8x128xf32>
    %26 = tpu.matmul %24, %25, %cst_15 {dimension_numbers = #tpu.dot_dimension_numbers<[1], [0], [0], [1], [0, 0, 1, 1], [], []>} : vector<8x128xbf16>, vector<128x128xbf16>, vector<8x128xf32> -> vector<8x128xf32>
    %c0_16 = arith.constant 0 : index
    %c0_17 = arith.constant 0 : index
    %27 = vector.load %arg7[%c0_16, %c0_17] : memref<1x128xf32, #tpu.memory_space<vmem>>, vector<1x128xf32>
    %28 = vector.broadcast %27 : vector<1x128xf32> to vector<8x128xf32>
    %29 = arith.addf %26, %28 : vector<8x128xf32>
    %c0_18 = arith.constant 0 : index
    %c0_19 = arith.constant 0 : index
    %30 = vector.load %arg9[%c0_18, %c0_19] : memref<8x128xf32, #tpu.memory_space<vmem>>, vector<8x128xf32>
    tpu.vector_store %arg9[%c0_18, %c0_19], %29 {strides = array<i32>} : memref<8x128xf32, #tpu.memory_space<vmem>>, vector<8x128xf32>,
    return
  }
  func.func @transform_0(%arg0: i32) -> (i32, i32) {
    %c0_i32 = arith.constant 0 : i32
    %c0_i32_0 = arith.constant 0 : i32
    return %arg0, %c0_i32 : i32, i32
  }
  func.func @transform_1(%arg0: i32) -> (i32, i32) {
    %c0_i32 = arith.constant 0 : i32
    %c0_i32_0 = arith.constant 0 : i32
    %c0_i32_1 = arith.constant 0 : i32
    return %c0_i32, %c0_i32_0 : i32, i32
  }
  func.func @transform_2(%arg0: i32) -> (i32, i32) {
    %c0_i32 = arith.constant 0 : i32
    %c0_i32_0 = arith.constant 0 : i32
    %c0_i32_1 = arith.constant 0 : i32
    return %c0_i32, %c0_i32_0 : i32, i32
  }
  func.func @transform_3(%arg0: i32) -> (i32, i32) {
    %c0_i32 = arith.constant 0 : i32
    %c0_i32_0 = arith.constant 0 : i32
    %c0_i32_1 = arith.constant 0 : i32
    return %c0_i32, %c0_i32_0 : i32, i32
  }
  func.func @transform_4(%arg0: i32) -> (i32, i32) {
    %c0_i32 = arith.constant 0 : i32
    %c0_i32_0 = arith.constant 0 : i32
    %c0_i32_1 = arith.constant 0 : i32
    return %c0_i32, %c0_i32_0 : i32, i32
  }
  func.func @transform_5(%arg0: i32) -> (i32, i32) {
    %c0_i32 = arith.constant 0 : i32
    %c0_i32_0 = arith.constant 0 : i32
    %c0_i32_1 = arith.constant 0 : i32
    return %c0_i32, %c0_i32_0 : i32, i32
  }
  func.func @transform_6(%arg0: i32) -> (i32, i32) {
    %c0_i32 = arith.constant 0 : i32
    %c0_i32_0 = arith.constant 0 : i32
    %c0_i32_1 = arith.constant 0 : i32
    return %c0_i32, %c0_i32_0 : i32, i32
  }
  func.func @transform_7(%arg0: i32) -> i32 {
    %c0_i32 = arith.constant 0 : i32
    %c0_i32_0 = arith.constant 0 : i32
    return %c0_i32 : i32
  }
  func.func @transform_8(%arg0: i32) -> (i32, i32) {
    %c0_i32 = arith.constant 0 : i32
    %c0_i32_0 = arith.constant 0 : i32
    return %arg0, %c0_i32 : i32, i32
  }
}

</mosaic_0001>

<bundles_post_ra>
// kernel: tpu_custom_call.1
= control target key start
LH: loop header
LB: loop body
LE: loop exit
PB: predicated region body
PF: predicated region fallthrough
CT: control target
= control target key end

     0   :  { %s1311_s0 = inlined_call_operand.hbm [shape: f32[16,32], index: 0, kind: input, shape index: {}]   ;;  %s1312_s1 = inlined_call_operand.hbm [shape: bf16[32,128], index: 1, kind: input, shape index: {}]   ;;  %s1313_s2 = inlined_call_operand.vmem [shape: f32[1,128], index: 2, kind: input, shape index: {}]   ;;  %s1314_s3 = inlined_call_operand.hbm [shape: bf16[128,128], index: 3, kind: input, shape index: {}]   ;;  %s1315_s4 = inlined_call_operand.vmem [shape: f32[1,128], index: 4, kind: input, shape index: {}]   ;;  %s1316_s5 = inlined_call_operand.hbm [shape: bf16[128,128], index: 5, kind: input, shape index: {}]   ;;  %s1317_s6 = inlined_call_operand.vmem [shape: f32[1,128], index: 6, kind: input, shape index: {}]   ;;  %s1318_s7 = inlined_call_operand.<no memory space> [shape: f32[1], index: 7, kind: input, shape index: {}]   ;;  %s1319_s8 = inlined_call_operand.hbm [shape: f32[16,128], index: 8, kind: output, shape index: {}]  }
   0x1   :  { %1320 = sst [smem:[#allocation16_spill]] %s1312_s1 }
   0x2   :  { %13 = sst [smem:[#allocation2]] %s1318_s7 }
   0x3   :  { %14 = vsyncpa [#allocation4], 0 }
   0x4   :  { %16 = vsyncpa [#allocation4 + $0x1], 0 }
   0x5   :  { %17 = vsyncpa [#allocation7], 0 }
   0x6   :  { %18 = vsyncpa [#allocation10], 0 }
   0x7   :  { %19 = vsyncpa [#allocation5], 0 }
   0x8   :  { %21 = vsyncpa [#allocation5 + $0x1], 0  ;;  %s1142_s29 = smov 0   ;;  %s1144_s30 = smov 0  }
   0x9   :  { %s1146_s9 = smov 0   ;;  %s1148_s10 = smov 0  }
   0xa LB: > { %s1321_s1 = sld [smem:[#allocation16_spill]]  ;;  %s1166_s13 = sadd.s32 4294967295, %s1087_s10   ;;  %s1087_s10 = sphi %s1148_s10, %s1332_s10   ;;  %s1083_s9 = sphi %s1146_s9, %s1331_s9   ;;  %s1079_s30 = sphi %s1144_s30, %s1330_s30   ;;  %s1075_s29 = sphi %s1142_s29, %s1329_s29  }
   0xb   : > { %p703_p0 = scmp.ge.s32.totalorder %s1087_s10, 1  ;;  %p48_p1 = scmp.eq.s32.totalorder %s1166_s13, 0 }
   0xc   : > { %p231_p2 = scmp.lt.s32.totalorder %s1087_s10, 3  ;;  %s1089_s15 = smov [#allocation6]  }
   0xd   : > { %s244_s16 = sshll.u32 %s1089_s15, 4  ;;  %s259_s19 = sshll.u32 %s1314_s3, 4  ;;  %s245_s16 = int_to_ptr.vmem [resolvable:$true] %s244_s16  ;;  %s260_s19 = int_to_ptr.hbm [resolvable:$true] %s259_s19 }
   0xe   : > { %p1171_p3 = pnand %p703_p0, %p231_p2  ;;  %s276_s23 = sshll.u32 %s1316_s5, 4  ;;  %s277_s23 = int_to_ptr.hbm [resolvable:$true] %s276_s23 }
   0xf   : > { %s1090_s24 = smov [#allocation8]   ;;  %s1091_s26 = smov 64  }
  0x10   : > { %s242_s12 = sshll.u32 %s1321_s1, 4  ;;  %p827_p4 = pneg %p1171_p3  ;;  %s243_s12 = int_to_ptr.hbm [resolvable:$true] %s242_s12 }
  0x11   : > { %s261_s25 = sshll.u32 %s1090_s24, 4  ;;  %s1092_s27 = smov 4   ;;  %s262_s25 = int_to_ptr.vmem [resolvable:$true] %s261_s25 }
  0x12   : > { %p1183_p6 = pnand %p827_p4, %p48_p1  ;;  %s1093_s28 = smov [#allocation9]  }
  0x13   : > { %s278_s7 = sshll.u32 %s1093_s28, 4  ;;  %s702_s11 = sadd.s32 4294967294, %s1087_s10   ;;  %s279_s7 = int_to_ptr.vmem [resolvable:$true] %s278_s7 }
  0x14   : > { %830 = dma.hbm_to_vmem [thread:$0]  (!%p1183_p6), %s243_s12, 256, %s245_s16, [#allocation7], %s1091_s26, %s1091_s26, %s1092_s27  }
  0x15   : > { %833 = dma.hbm_to_vmem [thread:$0]  (!%p1183_p6), %s260_s19, 1024, %s262_s25, [#allocation7], %s1091_s26, %s1091_s26, %s1092_s27  }
  0x16   : > { %836 = dma.hbm_to_vmem [thread:$0]  (!%p1183_p6), %s277_s23, 1024, %s279_s7, [#allocation10], %s1091_s26, %s1091_s26, %s1092_s27  }
  0x17   : > { %s1198_s15 = sadd.s32 1, %s1087_s10   ;;  %s34_s17 = sadd.s32 1, %s1083_s9 }
  0x18   : > { %s31_s12 = ssub.s32 %s1087_s10, %s1198_s15  ;;  %p41_p7 = scmp.ne.s32.totalorder %s1083_s9, %s1079_s30 }
  0x19   : > { %p32_p8 = scmp.eq.s32.totalorder %s31_s12, 0  ;;  %p42_p9 = scmp.eq.s32.totalorder %s1087_s10, 0 }
  0x1a   : > { %p47_p10 = scmp.ne.s32.totalorder %s1079_s30, %s1075_s29  ;;  %p218_p11 = scmp.eq.s32.totalorder %s1166_s13, 1 }
  0x1b   : > { %s1210_s16 = scalar_select %p32_p8, %s1083_s9, %s34_s17  }
  0x1c   : > { %p1214_p12 = por %p48_p1, %p47_p10  ;;  %p1218_p13 = por %p218_p11, %p41_p7 }
  0x1d   : > { %p224_p0 = scmp.eq.s32.totalorder %s702_s11, 1  ;;  %p43_p2 = por %p42_p9, %p41_p7 }
  0x1e   : > { %s298_s20 = sand.u32 1, %s1083_s9   ;;  %p848_p6 = scmp.lt.s32.totalorder %s1087_s10, 2 }
  0x1f   : > { %p1223_p4 = por %p224_p0, %p47_p10  ;;  %s708_s22 = sshll.u32 %s298_s20, 3 }
  0x20   : > { %s709_s23 = sshll.u32 %s1087_s10, 3  ;;  %s302_s28 = scalar_lea.vmem [#allocation3], %s708_s22 }
  0x21   : > { %s306_s26 = scalar_lea.hbm %s1311_s0, %s709_s23  ;;  %s310_s7 = sshll.u32 %s302_s28, 4  ;;  %s311_s7 = int_to_ptr.vmem [resolvable:$true] %s310_s7 }
  0x22   : > { %s308_s27 = sshll.u32 %s306_s26, 4  ;;  %p1232_p8 = pnand %p848_p6, %p43_p2  ;;  %s309_s27 = int_to_ptr.hbm [resolvable:$true] %s308_s27 }
  0x23   : > { %s299_s17 = scalar_lea.sflag [#allocation4], %s298_s20  ;;  %s983_s12 = sshra.s32 %s309_s27, 4  ;;  %s984_s12 = int_to_ptr.hbm [resolvable:$true] %s983_s12 }
  0x24   : > { %s985_s1 = scalar_lea.hbm %s984_s12, 8  ;;  %p987_p9 = pneg %p1232_p8 }
  0x25   : > { %p986_p7 = scmp.ne.s32.totalorder %s984_s12, %s985_s1  ;;  %s990_s22 = scalar_lea.hbm %s1311_s0, 16 }
  0x26   : > { %p991_p0 = scmp.lt.s32.totalorder %s984_s12, %s1311_s0  ;;  %p992_p2 = scmp.lt.s32.totalorder %s990_s22, %s985_s1 }
  0x27   : > { %p988_p10 = pnand %p987_p9, %p986_p7 }
  0x28   : > { %p993_p6 = por %p992_p2, %p991_p0 }
  0x29   : > { %p989_p11 = pneg %p988_p10 }
  0x2b   : > { %p994_p5 = pnand %p993_p6, %p989_p11 }
  0x2d   : > { %997 = shalt.err (!%p994_p5)
}
  0x2e   : > { %840 = dma.hbm_to_vmem [thread:$0]  (!%p1232_p8), %s309_s27, 128, %s311_s7, %s299_s17  }
  0x2f   : > { %319 = sbr.rel (%p1171_p3) target bundleno = 471 (0x1d7), region = 52  ;;  %s1249_s20 = sand.u32 (!%p1171_p3), 1, %s1079_s30  }
  0x30   : > { %s711_s28 = sshll.u32 (!%p1171_p3), %s1249_s20, 3  ;;  %s322_s23 = scalar_lea.sflag (!%p1171_p3), [#allocation4], %s1249_s20 }
  0x31   : > { %s325_s1 = scalar_lea.vmem (!%p1171_p3), [#allocation3], %s711_s28 }
  0x34   : > { %1058 = dma.done.wait (%p1214_p12), %s322_s23, 128  }
  0x35   : > { %1060 = vsyncadd (%p1214_p12), %s322_s23, 4294967168 }
  0x36   : > { %1062 = dma.done.wait (%p48_p1), [#allocation7], 1280  }
  0x37   : > { %1064 = vsyncadd (%p48_p1), [#allocation7], 4294966016 }
  0x38   : > { %1066 = dma.done.wait (%p48_p1), [#allocation10], 1024  }
  0x39   : > { %1068 = vsyncadd (%p48_p1), [#allocation10], 4294966272  ;;  %v794_v0 = vld [vmem:[#allocation6 + $0x8] sm:$0xff]  ;;  %v793_v2 = vld [vmem:[#allocation6] sm:$0xff]  ;;  %vm398_vm0 = vcmask 261120   ;;  %s375_s14 = sld [smem:[#allocation2]] }
  0x3a   : > { %v802_v1 = vld [vmem:[#allocation8 + $0x38] sm:$0xff]  ;;  %408 = vmatpush.bf16.msra.mxu0 %v794_v0  ;;  %v376_v3 = vld [vmem:[%s325_s1] sm:$0xff]  ;;  %v801_v4 = vld [vmem:[#allocation8 + $0x30] sm:$0xff]  ;;  %s790_s17 = sshll.u32 %s1166_s13, 3  ;;  %s373_s23 = scalar_lea.vmem [#allocation11], %s711_s28 }
  0x3b   : > { %488 = vmatpush.bf16.msra.mxu1 %v802_v1  ;;  %v377_v5 = vpack.c.bf16 %v376_v3, %v376_v3  ;;  %v800_v6 = vld [vmem:[#allocation8 + $0x28] sm:$0xff]  ;;  %v799_v7 = vld [vmem:[#allocation8 + $0x20] sm:$0xff]  ;;  %v798_v8 = vld [vmem:[#allocation8 + $0x18] sm:$0xff]  ;;  %s598_s22 = scalar_lea.hbm %s1319_s8, %s790_s17  ;;  %s600_s1 = sshll.u32 %s373_s23, 4  ;;  %s601_s1 = int_to_ptr.vmem [resolvable:$true] %s600_s1 }
  0x3c   : > { %v797_v9 = vld [vmem:[#allocation8 + $0x10] sm:$0xff]  ;;  %v796_v10 = vld [vmem:[#allocation8 + $0x8] sm:$0xff]  ;;  %v795_v11 = vld [vmem:[#allocation8] sm:$0xff]  ;;  %s588_s18 = scalar_lea.sflag [#allocation5], %s1249_s20  ;;  %s1033_s17 = scalar_lea.hbm %s1319_s8, 16 }
  0x3d   : > { %v810_v12 = vld [vmem:[#allocation9 + $0x38] sm:$0xff]  ;;  %v809_v13 = vld [vmem:[#allocation9 + $0x30] sm:$0xff]  ;;  %v808_v14 = vld [vmem:[#allocation9 + $0x28] sm:$0xff] }
  0x3e   : > { %409 = vmatpush.bf16.msra.mxu0 %v793_v2  ;;  %573 = vmatpush.bf16.msra.mxu2 %v810_v12  ;;  %v807_v15 = vld [vmem:[#allocation9 + $0x20] sm:$0xff]  ;;  %v806_v16 = vld [vmem:[#allocation9 + $0x18] sm:$0xff]  ;;  %v805_v17 = vld [vmem:[#allocation9 + $0x10] sm:$0xff] }
  0x3f   : > { %489 = vmatpush.bf16.msra.mxu1 %v801_v4  ;;  %v890_v18 = vld [vmem:[%s1313_s2] ss:$0 sm:$0xff]  ;;  %v416_v20 = vstv %s375_s14  ;;  %v804_v26 = vld [vmem:[#allocation9 + $0x8] sm:$0xff]  ;;  %s602_s14 = sshll.u32 %s598_s22, 4  ;;  %s603_s14 = int_to_ptr.hbm [resolvable:$true] %s602_s14 }
  0x40   : > { %v803_v27 = vld [vmem:[#allocation9] sm:$0xff]  ;;  %s1027_s13 = sshra.s32 %s603_s14, 4  ;;  %s1028_s13 = int_to_ptr.hbm [resolvable:$true] %s1027_s13 }
  0x41   : > { %724 = vmatmul.msk.bf16.vlgmr.msra.gmra.mxu0 %vm398_vm0, %v377_v5  ;;  %v891_v28 = vld [vmem:[%s1315_s4] ss:$0 sm:$0xff]  ;;  %s1029_s27 = scalar_lea.hbm %s1028_s13, 8  ;;  %p1034_p12 = scmp.lt.s32.totalorder %s1028_s13, %s1319_s8 }
  0x42   : > { %574 = vmatpush.bf16.msra.mxu2 %v809_v13  ;;  %v892_v35 = vld [vmem:[%s1317_s6] ss:$0 sm:$0xff]  ;;  %p1030_p1 = scmp.ne.s32.totalorder %s1028_s13, %s1029_s27  ;;  %p1035_p8 = scmp.lt.s32.totalorder %s1033_s17, %s1029_s27 }
  0x43   : > { %490 = vmatpush.bf16.msra.mxu1 %v800_v6 }
  0x44   : > { %p1031_p3 = pnand %p1030_p1, %p1218_p13  ;;  %p1036_p7 = por %p1035_p8, %p1034_p12 }
  0x46   : > { %575 = vmatpush.bf16.msra.mxu2 %v808_v14  ;;  %p1032_p5 = pneg %p1031_p3 }
  0x47   : > { %491 = vmatpush.bf16.msra.mxu1 %v799_v7 }
  0x48   : > { %p1037_p9 = pnand %p1036_p7, %p1032_p5 }
  0x4a   : > { %576 = vmatpush.bf16.msra.mxu2 %v807_v15 }
  0x4b   : > { %492 = vmatpush.bf16.msra.mxu1 %v798_v8 }
  0x4e   : > { %577 = vmatpush.bf16.msra.mxu2 %v806_v16 }
  0x4f   : > { %493 = vmatpush.bf16.msra.mxu1 %v797_v9 }
  0x52   : > { %578 = vmatpush.bf16.msra.mxu2 %v805_v17 }
  0x53   : > { %494 = vmatpush.bf16.msra.mxu1 %v796_v10 }
  0x56   : > { %579 = vmatpush.bf16.msra.mxu2 %v804_v26 }
  0x57   : > { %495 = vmatpush.bf16.msra.mxu1 %v795_v11 }
  0x5a   : > { %580 = vmatpush.bf16.msra.mxu2 %v803_v27 }
  0xbe   : > { %v411_v19 = vpop.f32.mrf.mxu0 }
  0xbf   : > { %v412_v21 = vadd.f32 %v890_v18, %v411_v19 }
  0xc1   : > { %v417_v22 = vmul.f32 %v416_v20, %v412_v21  ;;  %vm415_vm1 = vcmp.ge.f32.partialorder %v412_v21, 0.0 }
  0xc3   : > { %v418_v23 = vsel %vm415_vm1, %v412_v21, %v417_v22 }
  0xc4   : > { %v419_v24 = vpack.c.bf16 %v418_v23, %v418_v23 }
  0xc6   : > { %v413_v25 = vpop.f32.mrf.mxu0  ;;  %496 = vmatmul.bf16.vlgmr.msra.gmra.mxu1 %v419_v24 }
 0x143   : > { %v497_v29 = vpop.f32.mrf.mxu1 }
 0x144   : > { %v498_v30 = vadd.f32 %v891_v28, %v497_v29 }
 0x146   : > { %v502_v31 = vmul.f32 %v498_v30, %v416_v20  ;;  %vm501_vm2 = vcmp.ge.f32.partialorder %v498_v30, 0.0 }
 0x148   : > { %v503_v32 = vsel %vm501_vm2, %v498_v30, %v502_v31 }
 0x149   : > { %v504_v33 = vpack.c.bf16 %v503_v32, %v503_v32 }
 0x14b   : > { %v499_v34 = vpop.f32.mrf.mxu1  ;;  %581 = vmatmul.bf16.vlgmr.msra.gmra.mxu2 %v504_v33 }
 0x1ce   : > { %v582_v36 = vpop.f32.mrf.mxu2 }
 0x1cf   : > { %v583_v37 = vadd.f32 %v892_v35, %v582_v36 }
 0x1d1   : > { %586 = vst [vmem:[%s373_s23] sm:$0xff] %v583_v37 }
 0x1d2   : > { %1040 = shalt.err (!%p1037_p9)
}
 0x1d3   : > { %825 = dma.vmem_to_hbm [thread:$0]  (%p1218_p13), %s601_s1, 128, %s603_s14, %s588_s18  }
 0x1d6   : > { %v584_v38 = vpop.f32.mrf.mxu2 }
 0x1d7 PF: > { %s614_s20 = sand.u32 1, %s1075_s29   ;;  %p1328_p10 = scmp.ge.s32.totalorder %s1087_s10, 2 }
 0x1d8   : > { %s615_s24 = scalar_lea.sflag [#allocation5], %s614_s20 }
 0x1d9   : > { %p842_p11 = pnand %p1328_p10, %p1223_p4 }
 0x1db   : > { %p843_p0 = pneg %p842_p11 }
 0x1dd   : > { %1070 = dma.done.wait (%p843_p0), %s615_s24, 128  }
 0x1de   : > { %1072 = vsyncadd (%p843_p0), %s615_s24, 4294967168  ;;  %p24_p2 = scmp.ge.s32.totalorder %s1198_s15, 4   ;;  %s1329_s29 = smov %s1079_s30 }
 0x1df   : > { %s1330_s30 = smov %s1083_s9  ;;  %s1331_s9 = smov %s1210_s16 }
 0x1e0   : > { %s1332_s10 = smov %s1198_s15  ;;  %26 = sbr.rel (!%p24_p2) target bundleno = 10 (0xa), region = 109 }
 0x1e5   :  { %621 = vsyncpa [#allocation4], 1 }
 0x1e6   :  { %623 = vsyncpa [#allocation4 + $0x1], 1 }
 0x1e7   :  { %624 = vsyncpa [#allocation7], 1 }
 0x1e8   :  { %625 = vsyncpa [#allocation10], 1 }
 0x1e9   :  { %626 = vsyncpa [#allocation5], 1 }
 0x1ea   :  { %628 = vsyncpa [#allocation5 + $0x1], 1 }

// kernel: tpu_custom_call.1
= control target key start
LH: loop header
LB: loop body
LE: loop exit
PB: predicated region body
PF: predicated region fallthrough
CT: control target
= control target key end

     0   :  { %s1311_s0 = inlined_call_operand.hbm [shape: f32[16,32], index: 0, kind: input, shape index: {}]   ;;  %s1312_s1 = inlined_call_operand.hbm [shape: bf16[32,128], index: 1, kind: input, shape index: {}]   ;;  %s1313_s2 = inlined_call_operand.vmem [shape: f32[1,128], index: 2, kind: input, shape index: {}]   ;;  %s1314_s3 = inlined_call_operand.hbm [shape: bf16[128,128], index: 3, kind: input, shape index: {}]   ;;  %s1315_s4 = inlined_call_operand.vmem [shape: f32[1,128], index: 4, kind: input, shape index: {}]   ;;  %s1316_s5 = inlined_call_operand.hbm [shape: bf16[128,128], index: 5, kind: input, shape index: {}]   ;;  %s1317_s6 = inlined_call_operand.vmem [shape: f32[1,128], index: 6, kind: input, shape index: {}]   ;;  %s1318_s7 = inlined_call_operand.<no memory space> [shape: f32[1], index: 7, kind: input, shape index: {}]   ;;  %s1319_s8 = inlined_call_operand.hbm [shape: f32[16,128], index: 8, kind: output, shape index: {}]  }
   0x1   :  { %1320 = sst [smem:[#allocation16_spill]] %s1312_s1 }
   0x2   :  { %13 = sst [smem:[#allocation2]] %s1318_s7 }
   0x3   :  { %14 = vsyncpa [#allocation4], 0 }
   0x4   :  { %16 = vsyncpa [#allocation4 + $0x1], 0 }
   0x5   :  { %17 = vsyncpa [#allocation7], 0 }
   0x6   :  { %18 = vsyncpa [#allocation10], 0 }
   0x7   :  { %19 = vsyncpa [#allocation5], 0 }
   0x8   :  { %21 = vsyncpa [#allocation5 + $0x1], 0  ;;  %s1142_s29 = smov 0   ;;  %s1144_s30 = smov 0  }
   0x9   :  { %s1146_s9 = smov 0   ;;  %s1148_s10 = smov 0  }
   0xa LB: > { %s1321_s1 = sld [smem:[#allocation16_spill]]  ;;  %s1166_s13 = sadd.s32 4294967295, %s1087_s10   ;;  %s1087_s10 = sphi %s1148_s10, %s1332_s10   ;;  %s1083_s9 = sphi %s1146_s9, %s1331_s9   ;;  %s1079_s30 = sphi %s1144_s30, %s1330_s30   ;;  %s1075_s29 = sphi %s1142_s29, %s1329_s29  }
   0xb   : > { %p703_p0 = scmp.ge.s32.totalorder %s1087_s10, 1  ;;  %p48_p1 = scmp.eq.s32.totalorder %s1166_s13, 0 }
   0xc   : > { %p231_p2 = scmp.lt.s32.totalorder %s1087_s10, 3  ;;  %s1089_s15 = smov [#allocation6]  }
   0xd   : > { %s244_s16 = sshll.u32 %s1089_s15, 4  ;;  %s259_s19 = sshll.u32 %s1314_s3, 4  ;;  %s245_s16 = int_to_ptr.vmem [resolvable:$true] %s244_s16  ;;  %s260_s19 = int_to_ptr.hbm [resolvable:$true] %s259_s19 }
   0xe   : > { %p1171_p3 = pnand %p703_p0, %p231_p2  ;;  %s276_s23 = sshll.u32 %s1316_s5, 4  ;;  %s277_s23 = int_to_ptr.hbm [resolvable:$true] %s276_s23 }
   0xf   : > { %s1090_s24 = smov [#allocation8]   ;;  %s1091_s26 = smov 64  }
  0x10   : > { %s242_s12 = sshll.u32 %s1321_s1, 4  ;;  %p827_p4 = pneg %p1171_p3  ;;  %s243_s12 = int_to_ptr.hbm [resolvable:$true] %s242_s12 }
  0x11   : > { %s261_s25 = sshll.u32 %s1090_s24, 4  ;;  %s1092_s27 = smov 4   ;;  %s262_s25 = int_to_ptr.vmem [resolvable:$true] %s261_s25 }
  0x12   : > { %p1183_p6 = pnand %p827_p4, %p48_p1  ;;  %s1093_s28 = smov [#allocation9]  }
  0x13   : > { %s278_s7 = sshll.u32 %s1093_s28, 4  ;;  %s702_s11 = sadd.s32 4294967294, %s1087_s10   ;;  %s279_s7 = int_to_ptr.vmem [resolvable:$true] %s278_s7 }
  0x14   : > { %830 = dma.hbm_to_vmem [thread:$0]  (!%p1183_p6), %s243_s12, 256, %s245_s16, [#allocation7], %s1091_s26, %s1091_s26, %s1092_s27  }
  0x15   : > { %833 = dma.hbm_to_vmem [thread:$0]  (!%p1183_p6), %s260_s19, 1024, %s262_s25, [#allocation7], %s1091_s26, %s1091_s26, %s1092_s27  }
  0x16   : > { %836 = dma.hbm_to_vmem [thread:$0]  (!%p1183_p6), %s277_s23, 1024, %s279_s7, [#allocation10], %s1091_s26, %s1091_s26, %s1092_s27  }
  0x17   : > { %s1198_s15 = sadd.s32 1, %s1087_s10   ;;  %s34_s17 = sadd.s32 1, %s1083_s9 }
  0x18   : > { %s31_s12 = ssub.s32 %s1087_s10, %s1198_s15  ;;  %p41_p7 = scmp.ne.s32.totalorder %s1083_s9, %s1079_s30 }
  0x19   : > { %p32_p8 = scmp.eq.s32.totalorder %s31_s12, 0  ;;  %p42_p9 = scmp.eq.s32.totalorder %s1087_s10, 0 }
  0x1a   : > { %p47_p10 = scmp.ne.s32.totalorder %s1079_s30, %s1075_s29  ;;  %p218_p11 = scmp.eq.s32.totalorder %s1166_s13, 1 }
  0x1b   : > { %s1210_s16 = scalar_select %p32_p8, %s1083_s9, %s34_s17  }
  0x1c   : > { %p1214_p12 = por %p48_p1, %p47_p10  ;;  %p1218_p13 = por %p218_p11, %p41_p7 }
  0x1d   : > { %p224_p0 = scmp.eq.s32.totalorder %s702_s11, 1  ;;  %p43_p2 = por %p42_p9, %p41_p7 }
  0x1e   : > { %s298_s20 = sand.u32 1, %s1083_s9   ;;  %p848_p6 = scmp.lt.s32.totalorder %s1087_s10, 2 }
  0x1f   : > { %p1223_p4 = por %p224_p0, %p47_p10  ;;  %s708_s22 = sshll.u32 %s298_s20, 3 }
  0x20   : > { %s709_s23 = sshll.u32 %s1087_s10, 3  ;;  %s302_s28 = scalar_lea.vmem [#allocation3], %s708_s22 }
  0x21   : > { %s306_s26 = scalar_lea.hbm %s1311_s0, %s709_s23  ;;  %s310_s7 = sshll.u32 %s302_s28, 4  ;;  %s311_s7 = int_to_ptr.vmem [resolvable:$true] %s310_s7 }
  0x22   : > { %s308_s27 = sshll.u32 %s306_s26, 4  ;;  %p1232_p8 = pnand %p848_p6, %p43_p2  ;;  %s309_s27 = int_to_ptr.hbm [resolvable:$true] %s308_s27 }
  0x23   : > { %s299_s17 = scalar_lea.sflag [#allocation4], %s298_s20  ;;  %s983_s12 = sshra.s32 %s309_s27, 4  ;;  %s984_s12 = int_to_ptr.hbm [resolvable:$true] %s983_s12 }
  0x24   : > { %s985_s1 = scalar_lea.hbm %s984_s12, 8  ;;  %p987_p9 = pneg %p1232_p8 }
  0x25   : > { %p986_p7 = scmp.ne.s32.totalorder %s984_s12, %s985_s1  ;;  %s990_s22 = scalar_lea.hbm %s1311_s0, 16 }
  0x26   : > { %p991_p0 = scmp.lt.s32.totalorder %s984_s12, %s1311_s0  ;;  %p992_p2 = scmp.lt.s32.totalorder %s990_s22, %s985_s1 }
  0x27   : > { %p988_p10 = pnand %p987_p9, %p986_p7 }
  0x28   : > { %p993_p6 = por %p992_p2, %p991_p0 }
  0x29   : > { %p989_p11 = pneg %p988_p10 }
  0x2b   : > { %p994_p5 = pnand %p993_p6, %p989_p11 }
  0x2d   : > { %997 = shalt.err (!%p994_p5)
}
  0x2e   : > { %840 = dma.hbm_to_vmem [thread:$0]  (!%p1232_p8), %s309_s27, 128, %s311_s7, %s299_s17  }
  0x2f   : > { %319 = sbr.rel (%p1171_p3) target bundleno = 471 (0x1d7), region = 52  ;;  %s1249_s20 = sand.u32 (!%p1171_p3), 1, %s1079_s30  }
  0x30   : > { %s711_s28 = sshll.u32 (!%p1171_p3), %s1249_s20, 3  ;;  %s322_s23 = scalar_lea.sflag (!%p1171_p3), [#allocation4], %s1249_s20 }
  0x31   : > { %s325_s1 = scalar_lea.vmem (!%p1171_p3), [#allocation3], %s711_s28 }
  0x34   : > { %1058 = dma.done.wait (%p1214_p12), %s322_s23, 128  }
  0x35   : > { %1060 = vsyncadd (%p1214_p12), %s322_s23, 4294967168 }
  0x36   : > { %1062 = dma.done.wait (%p48_p1), [#allocation7], 1280  }
  0x37   : > { %1064 = vsyncadd (%p48_p1), [#allocation7], 4294966016 }
  0x38   : > { %1066 = dma.done.wait (%p48_p1), [#allocation10], 1024  }
  0x39   : > { %1068 = vsyncadd (%p48_p1), [#allocation10], 4294966272  ;;  %v794_v0 = vld [vmem:[#allocation6 + $0x8] sm:$0xff]  ;;  %v793_v2 = vld [vmem:[#allocation6] sm:$0xff]  ;;  %vm398_vm0 = vcmask 261120   ;;  %s375_s14 = sld [smem:[#allocation2]] }
  0x3a   : > { %v802_v1 = vld [vmem:[#allocation8 + $0x38] sm:$0xff]  ;;  %408 = vmatpush.bf16.msra.mxu0 %v794_v0  ;;  %v376_v3 = vld [vmem:[%s325_s1] sm:$0xff]  ;;  %v801_v4 = vld [vmem:[#allocation8 + $0x30] sm:$0xff]  ;;  %s790_s17 = sshll.u32 %s1166_s13, 3  ;;  %s373_s23 = scalar_lea.vmem [#allocation11], %s711_s28 }
  0x3b   : > { %488 = vmatpush.bf16.msra.mxu1 %v802_v1  ;;  %v377_v5 = vpack.c.bf16 %v376_v3, %v376_v3  ;;  %v800_v6 = vld [vmem:[#allocation8 + $0x28] sm:$0xff]  ;;  %v799_v7 = vld [vmem:[#allocation8 + $0x20] sm:$0xff]  ;;  %v798_v8 = vld [vmem:[#allocation8 + $0x18] sm:$0xff]  ;;  %s598_s22 = scalar_lea.hbm %s1319_s8, %s790_s17  ;;  %s600_s1 = sshll.u32 %s373_s23, 4  ;;  %s601_s1 = int_to_ptr.vmem [resolvable:$true] %s600_s1 }
  0x3c   : > { %v797_v9 = vld [vmem:[#allocation8 + $0x10] sm:$0xff]  ;;  %v796_v10 = vld [vmem:[#allocation8 + $0x8] sm:$0xff]  ;;  %v795_v11 = vld [vmem:[#allocation8] sm:$0xff]  ;;  %s588_s18 = scalar_lea.sflag [#allocation5], %s1249_s20  ;;  %s1033_s17 = scalar_lea.hbm %s1319_s8, 16 }
  0x3d   : > { %v810_v12 = vld [vmem:[#allocation9 + $0x38] sm:$0xff]  ;;  %v809_v13 = vld [vmem:[#allocation9 + $0x30] sm:$0xff]  ;;  %v808_v14 = vld [vmem:[#allocation9 + $0x28] sm:$0xff] }
  0x3e   : > { %409 = vmatpush.bf16.msra.mxu0 %v793_v2  ;;  %573 = vmatpush.bf16.msra.mxu2 %v810_v12  ;;  %v807_v15 = vld [vmem:[#allocation9 + $0x20] sm:$0xff]  ;;  %v806_v16 = vld [vmem:[#allocation9 + $0x18] sm:$0xff]  ;;  %v805_v17 = vld [vmem:[#allocation9 + $0x10] sm:$0xff] }
  0x3f   : > { %489 = vmatpush.bf16.msra.mxu1 %v801_v4  ;;  %v890_v18 = vld [vmem:[%s1313_s2] ss:$0 sm:$0xff]  ;;  %v416_v20 = vstv %s375_s14  ;;  %v804_v26 = vld [vmem:[#allocation9 + $0x8] sm:$0xff]  ;;  %s602_s14 = sshll.u32 %s598_s22, 4  ;;  %s603_s14 = int_to_ptr.hbm [resolvable:$true] %s602_s14 }
  0x40   : > { %v803_v27 = vld [vmem:[#allocation9] sm:$0xff]  ;;  %s1027_s13 = sshra.s32 %s603_s14, 4  ;;  %s1028_s13 = int_to_ptr.hbm [resolvable:$true] %s1027_s13 }
  0x41   : > { %724 = vmatmul.msk.bf16.vlgmr.msra.gmra.mxu0 %vm398_vm0, %v377_v5  ;;  %v891_v28 = vld [vmem:[%s1315_s4] ss:$0 sm:$0xff]  ;;  %s1029_s27 = scalar_lea.hbm %s1028_s13, 8  ;;  %p1034_p12 = scmp.lt.s32.totalorder %s1028_s13, %s1319_s8 }
  0x42   : > { %574 = vmatpush.bf16.msra.mxu2 %v809_v13  ;;  %v892_v35 = vld [vmem:[%s1317_s6] ss:$0 sm:$0xff]  ;;  %p1030_p1 = scmp.ne.s32.totalorder %s1028_s13, %s1029_s27  ;;  %p1035_p8 = scmp.lt.s32.totalorder %s1033_s17, %s1029_s27 }
  0x43   : > { %490 = vmatpush.bf16.msra.mxu1 %v800_v6 }
  0x44   : > { %p1031_p3 = pnand %p1030_p1, %p1218_p13  ;;  %p1036_p7 = por %p1035_p8, %p1034_p12 }
  0x46   : > { %575 = vmatpush.bf16.msra.mxu2 %v808_v14  ;;  %p1032_p5 = pneg %p1031_p3 }
  0x47   : > { %491 = vmatpush.bf16.msra.mxu1 %v799_v7 }
  0x48   : > { %p1037_p9 = pnand %p1036_p7, %p1032_p5 }
  0x4a   : > { %576 = vmatpush.bf16.msra.mxu2 %v807_v15 }
  0x4b   : > { %492 = vmatpush.bf16.msra.mxu1 %v798_v8 }
  0x4e   : > { %577 = vmatpush.bf16.msra.mxu2 %v806_v16 }
  0x4f   : > { %493 = vmatpush.bf16.msra.mxu1 %v797_v9 }
  0x52   : > { %578 = vmatpush.bf16.msra.mxu2 %v805_v17 }
  0x53   : > { %494 = vmatpush.bf16.msra.mxu1 %v796_v10 }
  0x56   : > { %579 = vmatpush.bf16.msra.mxu2 %v804_v26 }
  0x57   : > { %495 = vmatpush.bf16.msra.mxu1 %v795_v11 }
  0x5a   : > { %580 = vmatpush.bf16.msra.mxu2 %v803_v27 }
  0xbe   : > { %v411_v19 = vpop.f32.mrf.mxu0 }
  0xbf   : > { %v412_v21 = vadd.f32 %v890_v18, %v411_v19 }
  0xc1   : > { %v417_v22 = vmul.f32 %v416_v20, %v412_v21  ;;  %vm415_vm1 = vcmp.ge.f32.partialorder %v412_v21, 0.0 }
  0xc3   : > { %v418_v23 = vsel %vm415_vm1, %v412_v21, %v417_v22 }
  0xc4   : > { %v419_v24 = vpack.c.bf16 %v418_v23, %v418_v23 }
  0xc6   : > { %v413_v25 = vpop.f32.mrf.mxu0  ;;  %496 = vmatmul.bf16.vlgmr.msra.gmra.mxu1 %v419_v24 }
 0x143   : > { %v497_v29 = vpop.f32.mrf.mxu1 }
 0x144   : > { %v498_v30 = vadd.f32 %v891_v28, %v497_v29 }
 0x146   : > { %v502_v31 = vmul.f32 %v498_v30, %v416_v20  ;;  %vm501_vm2 = vcmp.ge.f32.partialorder %v498_v30, 0.0 }
 0x148   : > { %v503_v32 = vsel %vm501_vm2, %v498_v30, %v502_v31 }
 0x149   : > { %v504_v33 = vpack.c.bf16 %v503_v32, %v503_v32 }
 0x14b   : > { %v499_v34 = vpop.f32.mrf.mxu1  ;;  %581 = vmatmul.bf16.vlgmr.msra.gmra.mxu2 %v504_v33 }
 0x1ce   : > { %v582_v36 = vpop.f32.mrf.mxu2 }
 0x1cf   : > { %v583_v37 = vadd.f32 %v892_v35, %v582_v36 }
 0x1d1   : > { %586 = vst [vmem:[%s373_s23] sm:$0xff] %v583_v37 }
 0x1d2   : > { %1040 = shalt.err (!%p1037_p9)
}
 0x1d3   : > { %825 = dma.vmem_to_hbm [thread:$0]  (%p1218_p13), %s601_s1, 128, %s603_s14, %s588_s18  }
 0x1d6   : > { %v584_v38 = vpop.f32.mrf.mxu2 }
 0x1d7 PF: > { %s614_s20 = sand.u32 1, %s1075_s29   ;;  %p1328_p10 = scmp.ge.s32.totalorder %s1087_s10, 2 }
 0x1d8   : > { %s615_s24 = scalar_lea.sflag [#allocation5], %s614_s20 }
 0x1d9   : > { %p842_p11 = pnand %p1328_p10, %p1223_p4 }
 0x1db   : > { %p843_p0 = pneg %p842_p11 }
 0x1dd   : > { %1070 = dma.done.wait (%p843_p0), %s615_s24, 128  }
 0x1de   : > { %1072 = vsyncadd (%p843_p0), %s615_s24, 4294967168  ;;  %p24_p2 = scmp.ge.s32.totalorder %s1198_s15, 4   ;;  %s1329_s29 = smov %s1079_s30 }
 0x1df   : > { %s1330_s30 = smov %s1083_s9  ;;  %s1331_s9 = smov %s1210_s16 }
 0x1e0   : > { %s1332_s10 = smov %s1198_s15  ;;  %26 = sbr.rel (!%p24_p2) target bundleno = 10 (0xa), region = 109 }
 0x1e5   :  { %621 = vsyncpa [#allocation4], 1 }
 0x1e6   :  { %623 = vsyncpa [#allocation4 + $0x1], 1 }
 0x1e7   :  { %624 = vsyncpa [#allocation7], 1 }
 0x1e8   :  { %625 = vsyncpa [#allocation10], 1 }
 0x1e9   :  { %626 = vsyncpa [#allocation5], 1 }
 0x1ea   :  { %628 = vsyncpa [#allocation5 + $0x1], 1 }

</bundles_post_ra>
